<compile_context>
chip_gen: v7x
topology: tpu7x:2x2x1
jax: 0.10.0
libtpu: 0.0.40
codegen_flags: <defaults>
</compile_context>

<pallas_src>
import functools

import jax
import jax.numpy as jnp
from jax.experimental import pallas as pl
from jax.experimental.pallas import tpu as pltpu

LN_EPS = 1e-5


def _round_up(x, m):
    return (x + m - 1) // m * m


def _vmem_capacity_bytes():
    """Physical VMEM per core; conservative v7x-safe fallback if unknown."""
    try:
        return int(pltpu.get_tpu_info().vmem_capacity_bytes)
    except Exception:
        return 64 << 20


def _merge_kernel(x_ref, w_ref, p_ref, o_ref, *, inv_half):
    # x_ref: (1, total, tm) bf16      w_ref: (half, total) bf16
    # p_ref: (half, 3) f32  columns = [bias, gamma, beta]
    # o_ref: (1, half, tm) out_dtype
    # bf16 operands, f32 MXU accumulation; LN math in f32 on the VPU/EUP.
    yT = jnp.dot(w_ref[...], x_ref[0],
                 preferred_element_type=jnp.float32)          # (half, tm)
    p = p_ref[...]
    yT = yT + p[:, 0:1]                                        # + bias
    # LayerNorm over the feature (sublane) axis; two-pass variance.
    mean = jnp.sum(yT, axis=0, keepdims=True) * inv_half       # (1, tm)
    yc = yT - mean
    var = jnp.sum(yc * yc, axis=0, keepdims=True) * inv_half
    yhat = yc * jax.lax.rsqrt(var + LN_EPS)
    o_ref[0] = (yhat * p[:, 1:2] + p[:, 2:3]).astype(o_ref.dtype)


def _proj_norm_t(x_t, w, bias, gamma, beta, *, out_dtype, tm_cap=16384):
    """Fused Linear(total->half) + LayerNorm(half), transposed layout.

    x_t: (b, total, S) bf16 ->  (b, half, S) out_dtype
    w:   (half, total)  (PyTorch nn.Linear weight layout)
    """
    b, total, S = x_t.shape
    half = w.shape[0]
    out_bytes = jnp.dtype(out_dtype).itemsize

    cap = _vmem_capacity_bytes()
    budget = int(cap * 0.45)                     # leave room for double-buffers
    # Per-column VMEM bytes: 2x bf16 x-tile bufs, 2x out bufs, ~4 f32 temps.
    per_col = 2 * total * 2 + 2 * half * out_bytes + 4 * half * 4
    const = 2 * half * total * 2 + (256 << 10)   # 2x resident weight + params
    tm_fit = max(128, (budget - const) // per_col)
    tm = int(min(tm_cap, tm_fit))

    # Keep >= 4 total grid steps when there's enough work so both v7x TCs get
    # >= 2 steps each (also gives pipelining depth on v5e/v6e).
    want_steps = 4
    blocks_wanted = -(-want_steps // b)
    if blocks_wanted > 1 and S > blocks_wanted * 128:
        tm = min(tm, _round_up(-(-S // blocks_wanted), 128))

    if tm >= S:
        tm, S_pad = S, S                          # full-dim block, no padding
    else:
        tm = max(128, (tm // 128) * 128)          # lane-dense output blocks
        S_pad = _round_up(S, tm)
        if S_pad != S:
            x_t = jnp.pad(x_t, ((0, 0), (0, 0), (0, S_pad - S)))

    grid = (b, S_pad // tm)

    w_bf = w.astype(jnp.bfloat16)                               # (half, total)
    p = jnp.stack([bias, gamma, beta], axis=1).astype(jnp.float32)  # (half, 3)

    vmem_est = (2 * tm * total * 2            # double-buffered x tiles (bf16)
                + 2 * half * tm * out_bytes   # double-buffered out tiles
                + 4 * half * tm * 4           # f32 temporaries inside kernel
                + 2 * half * total * 2        # double-buffered resident weight
                + 2 * half * 128 * 4)         # params (lane-padded)
    vmem_limit = int(min(int(cap * 0.75),
                         max(16 << 20, vmem_est + max(vmem_est // 2, 8 << 20))))

    m_rows = b * S_pad
    cost = pl.CostEstimate(
        flops=int(2 * m_rows * total * half + 8 * m_rows * half),
        transcendentals=int(m_rows),
        bytes_accessed=int(m_rows * total * 2 + half * total * 2
                           + m_rows * half * out_bytes),
    )

    out = pl.pallas_call(
        functools.partial(_merge_kernel, inv_half=1.0 / half),
        out_shape=jax.ShapeDtypeStruct((b, half, S_pad), out_dtype),
        grid_spec=pltpu.PrefetchScalarGridSpec(
            num_scalar_prefetch=0,
            grid=grid,
            in_specs=[
                pl.BlockSpec((1, total, tm), lambda bi, si: (bi, 0, si)),
                pl.BlockSpec((half, total), lambda bi, si: (0, 0)),
                pl.BlockSpec((half, 3), lambda bi, si: (0, 0)),
            ],
            out_specs=pl.BlockSpec((1, half, tm), lambda bi, si: (bi, 0, si)),
        ),
        compiler_params=pltpu.CompilerParams(
            dimension_semantics=("parallel", "parallel"),
            vmem_limit_bytes=vmem_limit,
            allow_input_fusion=[True, False, False]),
        cost_estimate=cost,
    )(x_t, w_bf, p)

    if S_pad != S:
        out = out[:, :, :S]
    return out


def merge4d_forward(x, params, kernel_size, *, out_dtype=None, tm_cap=16384):
    """x: (b, c, N*nk, D*dk, H*hk, W*wk) -> (b, half, N, D, H, W)."""
    nk, dk, hk, wk = kernel_size
    b, c, Nn, Dd, Hh, Ww = x.shape
    n, d, h, w = Nn // nk, Dd // dk, Hh // hk, Ww // wk
    total = nk * dk * hk * wk * c
    half = total // 2
    S = n * d * h * w
    out_dtype = x.dtype if out_dtype is None else out_dtype

    # einops 'b c (n nk)(d dk)(h hk)(w wk) -> b (nk dk hk wk c) (n d h w)':
    # one XLA transpose fusion (with the bf16 cast); the kernel then writes
    # the output directly in the final (b, half, n, d, h, w) layout.
    xr = x.reshape(b, c, n, nk, d, dk, h, hk, w, wk)
    xr = jnp.transpose(xr, (0, 3, 5, 7, 9, 1, 2, 4, 6, 8))
    x_t = xr.reshape(b, total, S).astype(jnp.bfloat16)

    out3d = _proj_norm_t(x_t, params["w"], params["bias"],
                         params["gamma"], params["beta"],
                         out_dtype=out_dtype, tm_cap=tm_cap)   # (b, half, S)
    return out3d.reshape(b, half, n, d, h, w)


def init_params(key, in_channels, kernel_size):
    nk, dk, hk, wk = kernel_size
    total = in_channels * nk * dk * hk * wk
    half = total // 2
    k1, k2 = jax.random.split(key)
    # nn.Linear-style uniform init; weight stored in PyTorch layout
    # (half, total) so the kernel computes  yT = W @ xT + b.
    bound = 1.0 / (total ** 0.5)
    w = jax.random.uniform(k1, (half, total), jnp.float32, -bound, bound)
    bias = jax.random.uniform(k2, (half,), jnp.float32, -bound, bound)
    gamma = jnp.ones((half,), jnp.float32)     # nn.LayerNorm defaults
    beta = jnp.zeros((half,), jnp.float32)
    return {"w": w, "bias": bias, "gamma": gamma, "beta": beta}


if __name__ == "__main__":
    key = jax.random.PRNGKey(0)
    kx, kp = jax.random.split(key)

    in_channels = 4
    kernel_size = (2, 2, 2, 2)
    # input: (b, c, N*nk, D*dk, H*hk, W*wk) = (2, 4, 4, 4, 4, 4)
    x = jax.random.normal(kx, (2, in_channels, 4, 4, 4, 4), jnp.float32)
    params = init_params(kp, in_channels, kernel_size)

    fwd = jax.jit(functools.partial(merge4d_forward, kernel_size=kernel_size))
    out = fwd(x, params)
    jax.block_until_ready(out)

    # shape sanity: (b, half, N, D, H, W) = (2, 32, 2, 2, 2, 2)
    assert out.shape == (2, 32, 2, 2, 2, 2), out.shape

    # pure-JAX reference with the same bf16 matmul operands / f32 accumulate
    b, c, Nn, Dd, Hh, Ww = x.shape
    nk, dk, hk, wk = kernel_size
    n, d, h, w = Nn // nk, Dd // dk, Hh // hk, Ww // wk
    xr = x.reshape(b, c, n, nk, d, dk, h, hk, w, wk)
    x2d = jnp.transpose(xr, (0, 2, 4, 6, 8, 3, 5, 7, 9, 1)).reshape(
        -1, c * nk * dk * hk * wk)
    y = jnp.dot(x2d.astype(jnp.bfloat16),
                params["w"].astype(jnp.bfloat16).T,
                preferred_element_type=jnp.float32) + params["bias"]
    mu = y.mean(-1, keepdims=True)
    var = ((y - mu) ** 2).mean(-1, keepdims=True)
    ref2d = (y - mu) / jnp.sqrt(var + LN_EPS) * params["gamma"] + params["beta"]
    ref = jnp.transpose(ref2d.reshape(b, n, d, h, w, -1), (0, 5, 1, 2, 3, 4))
    err = float(jnp.max(jnp.abs(out.astype(jnp.float32) - ref)))
    assert jnp.allclose(out.astype(jnp.float32), ref, atol=5e-3, rtol=5e-3), err

    print("KERNEL_OK")
</pallas_src>

<mosaic_0001>
module attributes {stable_mosaic.version = 11 : i64} {
  func.func @_merge_kernel(%arg0: i32, %arg1: i32, %arg2: memref<1x64x16xbf16, #tpu.memory_space<vmem>>, %arg3: memref<32x64xbf16, #tpu.memory_space<vmem>>, %arg4: memref<32x3xf32, #tpu.memory_space<vmem>>, %arg5: memref<1x32x16xf32, #tpu.memory_space<vmem>>) attributes {dimension_semantics = [#tpu.dimension_semantics<parallel>, #tpu.dimension_semantics<parallel>], iteration_bounds = array<i64: 2, 1>, scalar_prefetch = 0 : i64, scratch_operands = 0 : i64, tpu.core_type = #tpu.core_type<tc>, window_params = [{transform_indices = @transform_0, window_bounds = array<i64: 1, 64, 16>}, {pipeline_mode = #tpu.pipeline_mode<synchronous>, transform_indices = @transform_1, window_bounds = array<i64: 32, 64>}, {pipeline_mode = #tpu.pipeline_mode<synchronous>, transform_indices = @transform_2, window_bounds = array<i64: 32, 3>}, {transform_indices = @transform_3, window_bounds = array<i64: 1, 32, 16>}]} {
    %c0 = arith.constant 0 : index
    %c0_0 = arith.constant 0 : index
    %0 = vector.load %arg3[%c0, %c0_0] : memref<32x64xbf16, #tpu.memory_space<vmem>>, vector<32x64xbf16>
    %c0_1 = arith.constant 0 : index
    %c0_2 = arith.constant 0 : index
    %c0_3 = arith.constant 0 : index
    %1 = vector.load %arg2[%c0_1, %c0_2, %c0_3] : memref<1x64x16xbf16, #tpu.memory_space<vmem>>, vector<1x64x16xbf16>
    %2 = vector.shape_cast %1 : vector<1x64x16xbf16> to vector<64x16xbf16>
    %cst = arith.constant dense<0.000000e+00> : vector<32x16xf32>
    %3 = tpu.matmul %0, %2, %cst {dimension_numbers = #tpu.dot_dimension_numbers<[1], [0], [0], [1], [0, 0, 1, 1], [], []>} : vector<32x64xbf16>, vector<64x16xbf16>, vector<32x16xf32> -> vector<32x16xf32>
    %c0_4 = arith.constant 0 : index
    %c0_5 = arith.constant 0 : index
    %4 = vector.load %arg4[%c0_4, %c0_5] : memref<32x3xf32, #tpu.memory_space<vmem>>, vector<32x3xf32>
    %5 = vector.extract_strided_slice %4 {offsets = [0, 0], sizes = [32, 1], strides = [1, 1]} : vector<32x3xf32> to vector<32x1xf32>
    %6 = vector.broadcast %5 : vector<32x1xf32> to vector<32x16xf32>
    %7 = arith.addf %3, %6 : vector<32x16xf32>
    %cst_6 = arith.constant dense<0.000000e+00> : vector<16xf32>
    %8 = vector.multi_reduction <add>, %7, %cst_6 [0] : vector<32x16xf32> to vector<16xf32>
    %9 = vector.shape_cast %8 : vector<16xf32> to vector<1x16xf32>
    %cst_7 = arith.constant 3.125000e-02 : f32
    %10 = vector.broadcast %cst_7 : f32 to vector<1x16xf32>
    %11 = arith.mulf %9, %10 : vector<1x16xf32>
    %12 = vector.broadcast %11 : vector<1x16xf32> to vector<32x16xf32>
    %13 = arith.subf %7, %12 : vector<32x16xf32>
    %14 = arith.mulf %13, %13 : vector<32x16xf32>
    %cst_8 = arith.constant dense<0.000000e+00> : vector<16xf32>
    %15 = vector.multi_reduction <add>, %14, %cst_8 [0] : vector<32x16xf32> to vector<16xf32>
    %16 = vector.shape_cast %15 : vector<16xf32> to vector<1x16xf32>
    %cst_9 = arith.constant 3.125000e-02 : f32
    %17 = vector.broadcast %cst_9 : f32 to vector<1x16xf32>
    %18 = arith.mulf %16, %17 : vector<1x16xf32>
    %cst_10 = arith.constant 9.99999974E-6 : f32
    %19 = vector.broadcast %cst_10 : f32 to vector<1x16xf32>
    %20 = arith.addf %18, %19 : vector<1x16xf32>
    %21 = math.rsqrt %20 : vector<1x16xf32>
    %22 = vector.broadcast %21 : vector<1x16xf32> to vector<32x16xf32>
    %23 = arith.mulf %13, %22 : vector<32x16xf32>
    %24 = vector.extract_strided_slice %4 {offsets = [0, 1], sizes = [32, 1], strides = [1, 1]} : vector<32x3xf32> to vector<32x1xf32>
    %25 = vector.broadcast %24 : vector<32x1xf32> to vector<32x16xf32>
    %26 = arith.mulf %23, %25 : vector<32x16xf32>
    %27 = vector.extract_strided_slice %4 {offsets = [0, 2], sizes = [32, 1], strides = [1, 1]} : vector<32x3xf32> to vector<32x1xf32>
    %28 = vector.broadcast %27 : vector<32x1xf32> to vector<32x16xf32>
    %29 = arith.addf %26, %28 : vector<32x16xf32>
    %c0_11 = arith.constant 0 : index
    %c0_12 = arith.constant 0 : index
    %c0_13 = arith.constant 0 : index
    %30 = vector.load %arg5[%c0_11, %c0_12, %c0_13] : memref<1x32x16xf32, #tpu.memory_space<vmem>>, vector<1x32x16xf32>
    %31 = vector.shape_cast %30 : vector<1x32x16xf32> to vector<32x16xf32>
    %32 = vector.shape_cast %29 : vector<32x16xf32> to vector<1x32x16xf32>
    tpu.vector_store %arg5[%c0_11, %c0_12, %c0_13], %32 {strides = array<i32>} : memref<1x32x16xf32, #tpu.memory_space<vmem>>, vector<1x32x16xf32>,
    return
  }
  func.func @transform_0(%arg0: i32, %arg1: i32) -> (i32, i32, i32) {
    %c0_i32 = arith.constant 0 : i32
    %c0_i32_0 = arith.constant 0 : i32
    return %arg0, %c0_i32, %arg1 : i32, i32, i32
  }
  func.func @transform_1(%arg0: i32, %arg1: i32) -> (i32, i32) {
    %c0_i32 = arith.constant 0 : i32
    %c0_i32_0 = arith.constant 0 : i32
    %c0_i32_1 = arith.constant 0 : i32
    return %c0_i32, %c0_i32_0 : i32, i32
  }
  func.func @transform_2(%arg0: i32, %arg1: i32) -> (i32, i32) {
    %c0_i32 = arith.constant 0 : i32
    %c0_i32_0 = arith.constant 0 : i32
    %c0_i32_1 = arith.constant 0 : i32
    return %c0_i32, %c0_i32_0 : i32, i32
  }
  func.func @transform_3(%arg0: i32, %arg1: i32) -> (i32, i32, i32) {
    %c0_i32 = arith.constant 0 : i32
    %c0_i32_0 = arith.constant 0 : i32
    return %arg0, %c0_i32, %arg1 : i32, i32, i32
  }
}

</mosaic_0001>

<bundles_post_ra>
// kernel: merge4d_forward.1
= control target key start
LH: loop header
LB: loop body
LE: loop exit
PB: predicated region body
PF: predicated region fallthrough
CT: control target
= control target key end

     0   :  { %s626_s12 = smov 0   ;;  %s628_s13 = smov 0   ;;  %s698_s0 = inlined_call_operand.vmem [shape: bf16[2,64,16], index: 0, kind: input, shape index: {}]   ;;  %s699_s1 = inlined_call_operand.vmem [shape: bf16[32,64], index: 1, kind: input, shape index: {}]   ;;  %s700_s2 = inlined_call_operand.vmem [shape: f32[32,3], index: 2, kind: input, shape index: {}]   ;;  %s701_s3 = inlined_call_operand.vmem [shape: f32[2,32,16], index: 3, kind: output, shape index: {}]  }
   0x1   :  { %s630_s14 = smov 0  }
   0x2 LB: > { %s25_s15 = sadd.s32 1, %s597_s13  ;;  %p503_p0 = scmp.ge.s32.totalorder %s601_s14, 1  ;;  %s601_s14 = sphi %s630_s14, %s13_s14   ;;  %s597_s13 = sphi %s628_s13, %s703_s13   ;;  %s593_s12 = sphi %s626_s12, %s702_s12  }
   0x3   : > { %p27_p1 = scmp.ge.s32.totalorder %s25_s15, 2  ;;  %p156_p2 = scmp.lt.s32.totalorder %s601_s14, 3 }
   0x5   : > { %s705_s15 = smov (%p27_p1, %s25_s15), 0  ;;  %p157_p3 = pnand %p503_p0, %p156_p2 }
   0x6   : > { %p186_p4 = scmp.lt.s32.totalorder (!%p157_p3), %s593_s12, 1  ;;  %v575_v0 = vld [vmem:[%s699_s1] sm:$0xff] (!%p157_p3)   ;;  %vm273_vm0 = vcmask (!%p157_p3), 523264   ;;  %v217_v2 = vld [vmem:[%s700_s2 + $0x10] sm:$0xff] (!%p157_p3)  ;;  %v603_v3 = vmov (!%p157_p3), 0   ;;  %v216_v4 = vld [vmem:[%s700_s2 + $0x8] sm:$0xff] (!%p157_p3) }
   0x7   : > { %160 = sbr.rel (%p157_p3) target bundleno = 318 (0x13e), region = 32  ;;  %534 = vmatprep.mubr.msk.bf16.mxu0 (!%p157_p3), %vm273_vm0, %v575_v0  ;;  %v215_v1 = vld [vmem:[%s700_s2] sm:$0xff] (!%p157_p3)  ;;  %565 = vset.pattern.permute.xlu0 (!%p157_p3), %v603_v3  ;;  %v218_v5 = vld [vmem:[%s700_s2 + $0x18] sm:$0xff] (!%p157_p3)  ;;  %v604_v9 = vmov (!%p157_p3), 1   ;;  %v576_v11 = vld [vmem:[%s699_s1 + $0x8] sm:$0xff] (!%p157_p3)   ;;  %v605_v12 = vmov (!%p157_p3), 2  }
   0x8   : > { %566 = vset.pattern.permute.xlu1 (!%p157_p3), %v603_v3  ;;  %221 = vperm.xlu0 (!%p157_p3), %565, %v215_v1   ;;  %vm329_vm1 = vcmask (!%p157_p3), 130048  }
   0x9   : > { %231 = vperm.xlu1 (!%p157_p3), %566, %v217_v2  }
   0xc   : > { %226 = vperm.xlu0 (!%p157_p3), %565, %v216_v4  }
   0xd   : > { %236 = vperm.xlu1 (!%p157_p3), %566, %v218_v5  }
   0xe   : > { %s707_s12 = smov (!%p186_p4, %s593_s12), 1 }
   0xf   : > { %s518_s22 = sshll.u32 %s707_s12, 5 }
  0x10   : > { %s193_s25 = scalar_lea.vmem %s698_s0, %s518_s22  ;;  %567 = vset.pattern.permute.xlu0 %v604_v9  ;;  %s201_s7 = scalar_lea.vmem %s701_s3, %s518_s22 }
  0x11   : > { %v571_v6 = vld [vmem:[%s193_s25] sm:$0xff]   ;;  %v572_v7 = vld [vmem:[%s193_s25 + $0x8] sm:$0xff]   ;;  %v573_v8 = vld [vmem:[%s193_s25 + $0x10] sm:$0xff]   ;;  %568 = vset.pattern.permute.xlu1 %v604_v9  ;;  %373 = vperm.xlu0 %567, %v215_v1  }
  0x12   : > { %526 = vmatprep.subr.bf16.mxu0 %v571_v6  ;;  %v574_v10 = vld [vmem:[%s193_s25 + $0x18] sm:$0xff]   ;;  %377 = vperm.xlu1 %568, %v216_v4  }
  0x13   : > { %527 = vmatpush3.bf16.msra.mxu0 %v571_v6 }
  0x14   : > { %528 = vmatprep.subr.bf16.mxu0 %v572_v7 }
  0x15   : > { %385 = vperm.xlu0 %567, %v218_v5  }
  0x16   : > { %381 = vperm.xlu1 %568, %v217_v2  }
  0x17   : > { %529 = vmatpush3.bf16.msra.mxu0 %v572_v7 }
  0x18   : > { %530 = vmatprep.subr.bf16.mxu0 %v573_v8 }
  0x19   : > { %570 = vset.pattern.permute.xlu0 %v605_v12 }
  0x1a   : > { %569 = vset.pattern.permute.xlu1 %v605_v12  ;;  %397 = vperm.xlu0 %570, %v216_v4  }
  0x1b   : > { %531 = vmatpush3.bf16.msra.mxu0 %v573_v8  ;;  %393 = vperm.xlu1 %569, %v215_v1  }
  0x1c   : > { %532 = vmatprep.subr.bf16.mxu0 %v574_v10 }
  0x1f   : > { %533 = vmatpush3.bf16.msra.mxu0 %v574_v10  ;;  %401 = vperm.xlu1 %569, %v217_v2  }
  0x22   : > { %535 = vmatmul.mubr.msk.bf16.vlgmr.msra.gmra.mrb[0].mxu0 %vm273_vm0, %v576_v11 }
  0x23   : > { %405 = vperm.xlu1 %569, %v218_v5  }
  0x87   : > { %v222_v13 = vpop.permute.xlu0 %221 }
  0x88   : > { %v232_v14 = vpop.permute.xlu1 %231 }
  0x8b   : > { %v227_v17 = vpop.permute.xlu0 %226 }
  0x8c   : > { %v237_v20 = vpop.permute.xlu1 %236 }
  0x90   : > { %v374_v1 = vpop.permute.xlu0 %373 }
  0x91   : > { %v378_v58 = vpop.permute.xlu1 %377 }
  0x94   : > { %v386_v3 = vpop.permute.xlu0 %385 }
  0x95   : > { %v382_v62 = vpop.permute.xlu1 %381 }
  0x99   : > { %v398_v9 = vpop.permute.xlu0 %397 }
  0x9a   : > { %v394_v0 = vpop.permute.xlu1 %393 }
  0x9e   : > { %v402_v2 = vpop.permute.xlu1 %401 }
  0xf5   : > { %v536_v15 = vpop.f32.mrb[0].mxu0 }
  0xf6   : > { %v314_v16 = vpop.f32.mrb[1].mxu0  ;;  %v323_v22 = vadd.f32 %v536_v15, %v232_v14  ;;  %v406_v14 = vpop.permute.xlu1 %405 }
  0xf7   : > { %v315_v18 = vadd.f32 %v314_v16, %v222_v13  ;;  %v537_v19 = vpop.f32.mrb[2].mxu0 }
  0xf8   : > { %v317_v21 = vpop.f32.mrb[3].mxu0  ;;  %v326_v25 = vadd.f32 %v537_v19, %v237_v20  ;;  %v333_v28 = vsel %vm329_vm1, %v323_v22, 0.0 }
  0xf9   : > { %v318_v23 = vadd.f32 %v317_v21, %v227_v17  ;;  %v330_v24 = vsel %vm329_vm1, %v315_v18, 0.0 }
  0xfa   : > { %v335_v30 = vsel %vm329_vm1, %v326_v25, 0.0 }
  0xfb   : > { %v331_v26 = vsel %vm329_vm1, %v318_v23, 0.0 }
  0xfc   : > { %v332_v27 = vadd.f32 %v331_v26, %v330_v24 }
  0xfe   : > { %v334_v29 = vadd.f32 %v333_v28, %v332_v27 }
 0x100   : > { %v336_v31 = vadd.f32 %v335_v30, %v334_v29 }
 0x102   : > { %v337_v32 = vrot.slane %v336_v31, 4 }
 0x104   : > { %v338_v33 = vadd.f32 %v337_v32, %v336_v31 }
 0x106   : > { %v339_v34 = vrot.slane %v338_v33, 2 }
 0x108   : > { %v340_v35 = vadd.f32 %v339_v34, %v338_v33 }
 0x10a   : > { %v341_v36 = vrot.slane %v340_v35, 1 }
 0x10c   : > { %v342_v37 = vadd.f32 %v341_v36, %v340_v35 }
 0x10e   : > { %v343_v38 = vmul.f32 0.03125, %v342_v37 }
 0x110   : > { %v344_v39 = vsub.f32 %v315_v18, %v343_v38  ;;  %v345_v40 = vsub.f32 %v318_v23, %v343_v38  ;;  %v346_v41 = vsub.f32 %v323_v22, %v343_v38  ;;  %v347_v42 = vsub.f32 %v326_v25, %v343_v38 }
 0x112   : > { %v348_v43 = vmul.f32 %v344_v39, %v344_v39  ;;  %v349_v44 = vmul.f32 %v345_v40, %v345_v40  ;;  %v350_v45 = vmul.f32 %v346_v41, %v346_v41  ;;  %v351_v46 = vmul.f32 %v347_v42, %v347_v42 }
 0x114   : > { %v352_v47 = vsel %vm329_vm1, %v348_v43, 0.0  ;;  %v353_v48 = vsel %vm329_vm1, %v349_v44, 0.0  ;;  %v355_v50 = vsel %vm329_vm1, %v350_v45, 0.0  ;;  %v357_v52 = vsel %vm329_vm1, %v351_v46, 0.0 }
 0x115   : > { %v354_v49 = vadd.f32 %v353_v48, %v352_v47 }
 0x117   : > { %v356_v51 = vadd.f32 %v355_v50, %v354_v49 }
 0x119   : > { %v358_v53 = vadd.f32 %v357_v52, %v356_v51 }
 0x11b   : > { %v359_v54 = vrot.slane %v358_v53, 4 }
 0x11d   : > { %v360_v55 = vadd.f32 %v359_v54, %v358_v53 }
 0x11f   : > { %v361_v56 = vrot.slane %v360_v55, 2 }
 0x121   : > { %v362_v57 = vadd.f32 %v361_v56, %v360_v55 }
 0x123   : > { %v363_v59 = vrot.slane %v362_v57, 1 }
 0x125   : > { %v364_v60 = vadd.f32 %v363_v59, %v362_v57 }
 0x127   : > { %v365_v61 = vmul.f32 0.03125, %v364_v60 }
 0x129   : > { %v366_v63 = vadd.f32 1e-05, %v365_v61 }
 0x12b   : > { %577 = vrsqrt.f32 %v366_v63 }
 0x135   : > { %v578_v4 = vpop.eup %577 }
 0x136   : > { %v369_v5 = vmul.f32 %v578_v4, %v345_v40  ;;  %v370_v6 = vmul.f32 %v578_v4, %v346_v41  ;;  %v368_v7 = vmul.f32 %v578_v4, %v344_v39  ;;  %v371_v8 = vmul.f32 %v578_v4, %v347_v42 }
 0x138   : > { %v389_v10 = vmul.f32 %v378_v58, %v369_v5  ;;  %v390_v11 = vmul.f32 %v382_v62, %v370_v6  ;;  %v388_v12 = vmul.f32 %v374_v1, %v368_v7  ;;  %v391_v13 = vmul.f32 %v386_v3, %v371_v8 }
 0x13a   : > { %v408_v15 = vadd.f32 %v394_v0, %v388_v12  ;;  %v410_v16 = vadd.f32 %v402_v2, %v390_v11  ;;  %v411_v17 = vadd.f32 %v406_v14, %v391_v13  ;;  %v409_v18 = vadd.f32 %v398_v9, %v389_v10 }
 0x13c   : > { %412 = vst.msk [vmem:[%s201_s7] sm:$0xff] %vm329_vm1, %v408_v15  ;;  %414 = vst.msk [vmem:[%s201_s7 + $0x10] sm:$0xff] %vm329_vm1, %v410_v16 }
 0x13d   : > { %415 = vst.msk [vmem:[%s201_s7 + $0x18] sm:$0xff] %vm329_vm1, %v411_v17  ;;  %413 = vst.msk [vmem:[%s201_s7 + $0x8] sm:$0xff] %vm329_vm1, %v409_v18 }
 0x13e PF: > { %s13_s14 = sadd.s32 1, %s601_s14   ;;  %s702_s12 = smov %s597_s13 }
 0x13f   : > { %p10_p5 = scmp.ge.s32.totalorder %s13_s14, 4   ;;  %s703_s13 = smov %s705_s15 }
 0x141   :  { %12 = sbr.rel (!%p10_p5) target bundleno = 2 (0x2), region = 62 }

</bundles_post_ra>
